<compile_context>
chip_gen: v6e
topology: v6e:2x2x1
jax: 0.10.0
libtpu: 0.0.40
codegen_flags: <defaults>
</compile_context>

<pallas_src>
import math

import jax
import jax.numpy as jnp
from jax.experimental import pallas as pl
from jax.experimental.pallas import tpu as pltpu


def _layernorm(x, w, b, eps=1e-6):
    # The PyTorch module explicitly uses nn.LayerNorm(embed_size, eps=1e-06)
    # (biased variance), so eps=1e-6 is faithful to the spec.
    mu = jnp.mean(x, axis=-1, keepdims=True)
    var = jnp.mean((x - mu) ** 2, axis=-1, keepdims=True)
    return (x - mu) * jax.lax.rsqrt(var + eps) * w + b


def block_kernel(codes_ref, wqkv_ref, w1_ref, w2_ref, vecs_ref, temp_ref, out_ref):
    M, E = out_ref.shape
    mxu_dt = wqkv_ref.dtype                      # bf16 MXU operands

    codes = codes_ref[...]                       # (M+N, E) f32
    mc = codes[:M]                               # exact f32 residual path

    # ---- fused Q/K/V projection: ONE MXU matmul (packed weight, stacked LHS)
    proj = jnp.dot(codes.astype(mxu_dt), wqkv_ref[...],
                   preferred_element_type=jnp.float32)        # (M+N, 3E) f32

    inv_t = 1.0 / temp_ref[0, 0]                 # scalar from SMEM
    q = proj[:M, 0:E] * inv_t                    # temperature folded into q
    k_map = proj[:M, E:2 * E]
    v_map = proj[:M, 2 * E:3 * E]
    k_obs = proj[M:, E:2 * E]
    v_obs = proj[M:, 2 * E:3 * E]

    # ---- attention scores (contract last axes -> no materialized transpose)
    obs_att = jax.lax.dot_general(
        q, k_obs, (((1,), (1,)), ((), ())),
        preferred_element_type=jnp.float32)                   # (M, N)
    self_att = jnp.sum(q * k_map, axis=-1, keepdims=True)     # (M, 1)

    # ---- softmax over cat([self, obs], -1) without building the concat
    m = jnp.maximum(self_att, jnp.max(obs_att, axis=-1, keepdims=True))
    e_self = jnp.exp(self_att - m)
    e_obs = jnp.exp(obs_att - m)
    denom = e_self + jnp.sum(e_obs, axis=-1, keepdims=True)
    inv = pl.reciprocal(denom, approx=True)                   # EUP slot
    p_self = e_self * inv                                     # (M, 1)
    p_obs = e_obs * inv                                       # (M, N)

    # self position weights map_value, the rest weight obs_value
    attn = p_self * v_map + jnp.dot(p_obs, v_obs,
                                    preferred_element_type=jnp.float32)

    # ---- packed (8, E) LayerNorm / bias vectors
    ln1_w = vecs_ref[0:1, :]
    ln1_b = vecs_ref[1:2, :]
    b1 = vecs_ref[2:3, :]
    b2 = vecs_ref[3:4, :]
    ln2_w = vecs_ref[4:5, :]
    ln2_b = vecs_ref[5:6, :]

    # residual + LayerNorm (attention output), all f32
    x = _layernorm(attn + mc, ln1_w, ln1_b)

    # ---- FeedForward: w2(relu(w1(x))) + x, then LayerNorm
    h = jnp.maximum(
        jnp.dot(x.astype(mxu_dt), w1_ref[...],
                preferred_element_type=jnp.float32) + b1, 0.0)
    y = jnp.dot(h.astype(mxu_dt), w2_ref[...],
                preferred_element_type=jnp.float32) + b2 + x
    out_ref[...] = _layernorm(y, ln2_w, ln2_b)


def block_forward(map_code, obs_code, params):
    M, E = map_code.shape

    # Stacked LHS: one (M+N, E) operand so the packed QKV weight is pushed to
    # the MXU exactly once for both map and obs codes.
    codes = jnp.concatenate([map_code, obs_code], axis=0).astype(jnp.float32)

    vmem = pl.BlockSpec(memory_space=pltpu.MemorySpace.VMEM)
    smem = pl.BlockSpec(memory_space=pltpu.MemorySpace.SMEM)

    return pl.pallas_call(
        block_kernel,
        out_shape=jax.ShapeDtypeStruct((M, E), jnp.float32),
        in_specs=[vmem, vmem, vmem, vmem, vmem, smem],
        out_specs=vmem,
    )(codes, params["w_qkv"], params["w1_w"], params["w2_w"],
      params["vec_pack"], params["temperature"])


def init_params(key, embed_size, mxu_dtype=jnp.bfloat16):
    """PyTorch-style init (uniform +/- 1/sqrt(fan_in); LayerNorm w=1, b=0).
    Linear weights are stored pre-transposed as (in, out); Q/K/V are packed
    into one (E, 3E) matrix; all (1, E) vectors are packed into one (8, E)
    tile; matmul weights are stored in bf16 (MXU operands)."""
    E = embed_size
    bound = 1.0 / math.sqrt(E)
    keys = jax.random.split(key, 7)

    def lin_w(k):
        return jax.random.uniform(k, (E, E), jnp.float32, -bound, bound)

    wq, wk, wv = lin_w(keys[0]), lin_w(keys[1]), lin_w(keys[2])
    w1, w2 = lin_w(keys[3]), lin_w(keys[5])
    b1 = jax.random.uniform(keys[4], (E,), jnp.float32, -bound, bound)
    b2 = jax.random.uniform(keys[6], (E,), jnp.float32, -bound, bound)

    # rows: 0 ln1_w, 1 ln1_b, 2 w1_b, 3 w2_b, 4 ln2_w, 5 ln2_b, 6-7 padding
    vec_pack = jnp.zeros((8, E), jnp.float32)
    vec_pack = vec_pack.at[0].set(1.0)
    vec_pack = vec_pack.at[2].set(b1)
    vec_pack = vec_pack.at[3].set(b2)
    vec_pack = vec_pack.at[4].set(1.0)

    return {
        "w_qkv": jnp.concatenate([wq, wk, wv], axis=1).astype(mxu_dtype),
        "w1_w": w1.astype(mxu_dtype),
        "w2_w": w2.astype(mxu_dtype),
        "vec_pack": vec_pack,
        "temperature": jnp.full((1, 1), E ** 0.5, jnp.float32),
    }


def block_reference(map_code, obs_code, p):
    """Pure-JAX reference mirroring the PyTorch forward (and the kernel's
    bf16-MXU-operand / f32-accumulate dtype policy), for a sanity check."""
    E = map_code.shape[-1]
    temp = p["temperature"][0, 0]
    mxu = p["w_qkv"].dtype
    wq, wk, wv = p["w_qkv"][:, :E], p["w_qkv"][:, E:2 * E], p["w_qkv"][:, 2 * E:]

    def mm(x, w):
        return jnp.dot(x.astype(mxu), w, preferred_element_type=jnp.float32)

    q = mm(map_code, wq)
    k_m, k_o = mm(map_code, wk), mm(obs_code, wk)
    v_m, v_o = mm(map_code, wv), mm(obs_code, wv)

    obs_att = q @ k_o.T
    self_att = jnp.sum(q * k_m, axis=-1, keepdims=True)
    whole = jnp.concatenate([self_att, obs_att], axis=-1) / temp
    whole = jax.nn.softmax(whole, axis=-1)
    new = whole[:, :1] * v_m + whole[:, 1:] @ v_o

    vec = p["vec_pack"]
    ln1_w, ln1_b, b1, b2, ln2_w, ln2_b = (vec[i:i + 1] for i in range(6))

    def ln(x, w, b):
        mu = jnp.mean(x, -1, keepdims=True)
        var = jnp.mean((x - mu) ** 2, -1, keepdims=True)
        return (x - mu) / jnp.sqrt(var + 1e-6) * w + b

    x = ln(new + map_code, ln1_w, ln1_b)
    h = jax.nn.relu(mm(x, p["w1_w"]) + b1)
    y = mm(h, p["w2_w"]) + b2 + x
    return ln(y, ln2_w, ln2_b)


if __name__ == "__main__":
    E = 128   # embed_size: multiple of 128 -> lane-dense layout everywhere
    M = 8     # number of map codes
    N = 8     # number of obs codes

    key = jax.random.PRNGKey(0)
    k_map, k_obs, k_param = jax.random.split(key, 3)
    map_code = jax.random.normal(k_map, (M, E), jnp.float32)
    obs_code = jax.random.normal(k_obs, (N, E), jnp.float32)
    params = init_params(k_param, E)

    out = jax.block_until_ready(block_forward(map_code, obs_code, params))
    ref = jax.block_until_ready(block_reference(map_code, obs_code, params))

    assert out.shape == (M, E)
    max_diff = float(jnp.max(jnp.abs(out - ref)))
    assert jnp.allclose(out, ref, atol=1e-2, rtol=1e-2), f"max abs diff {max_diff}"

    print("KERNEL_OK")
</pallas_src>

<mosaic_0001>
module attributes {stable_mosaic.version = 11 : i64} {
  func.func @block_kernel(%arg0: memref<16x128xf32, #tpu.memory_space<vmem>>, %arg1: memref<128x384xbf16, #tpu.memory_space<vmem>>, %arg2: memref<128x128xbf16, #tpu.memory_space<vmem>>, %arg3: memref<128x128xbf16, #tpu.memory_space<vmem>>, %arg4: memref<8x128xf32, #tpu.memory_space<vmem>>, %arg5: memref<1x1xf32, #tpu.memory_space<smem>>, %arg6: memref<8x128xf32, #tpu.memory_space<vmem>>) attributes {dimension_semantics = [], scalar_prefetch = 0 : i64, scratch_operands = 0 : i64, tpu.core_type = #tpu.core_type<tc>} {
    %c0 = arith.constant 0 : index
    %c0_0 = arith.constant 0 : index
    %0 = vector.load %arg0[%c0, %c0_0] : memref<16x128xf32, #tpu.memory_space<vmem>>, vector<16x128xf32>
    %1 = vector.extract_strided_slice %0 {offsets = [0, 0], sizes = [8, 128], strides = [1, 1]} : vector<16x128xf32> to vector<8x128xf32>
    %2 = arith.truncf %0 : vector<16x128xf32> to vector<16x128xbf16>
    %c0_1 = arith.constant 0 : index
    %c0_2 = arith.constant 0 : index
    %3 = vector.load %arg1[%c0_1, %c0_2] : memref<128x384xbf16, #tpu.memory_space<vmem>>, vector<128x384xbf16>
    %cst = arith.constant dense<0.000000e+00> : vector<16x384xf32>
    %4 = tpu.matmul %2, %3, %cst {dimension_numbers = #tpu.dot_dimension_numbers<[1], [0], [0], [1], [0, 0, 1, 1], [], []>} : vector<16x128xbf16>, vector<128x384xbf16>, vector<16x384xf32> -> vector<16x384xf32>
    %c0_3 = arith.constant 0 : index
    %c0_4 = arith.constant 0 : index
    %5 = memref.load %arg5[%c0_3, %c0_4] : memref<1x1xf32, #tpu.memory_space<smem>>
    %cst_5 = arith.constant 1.000000e+00 : f32
    %6 = arith.divf %cst_5, %5 : f32
    %7 = vector.extract_strided_slice %4 {offsets = [0, 0], sizes = [8, 128], strides = [1, 1]} : vector<16x384xf32> to vector<8x128xf32>
    %8 = vector.broadcast %6 : f32 to vector<8x128xf32>
    %9 = arith.mulf %7, %8 : vector<8x128xf32>
    %10 = vector.extract_strided_slice %4 {offsets = [0, 128], sizes = [8, 128], strides = [1, 1]} : vector<16x384xf32> to vector<8x128xf32>
    %11 = vector.extract_strided_slice %4 {offsets = [0, 256], sizes = [8, 128], strides = [1, 1]} : vector<16x384xf32> to vector<8x128xf32>
    %12 = vector.extract_strided_slice %4 {offsets = [8, 128], sizes = [8, 128], strides = [1, 1]} : vector<16x384xf32> to vector<8x128xf32>
    %13 = vector.extract_strided_slice %4 {offsets = [8, 256], sizes = [8, 128], strides = [1, 1]} : vector<16x384xf32> to vector<8x128xf32>
    %cst_6 = arith.constant dense<0.000000e+00> : vector<8x8xf32>
    %14 = tpu.matmul %9, %12, %cst_6 {dimension_numbers = #tpu.dot_dimension_numbers<[1], [1], [0], [0], [0, 0, 1, 0], [], []>} : vector<8x128xf32>, vector<8x128xf32>, vector<8x8xf32> -> vector<8x8xf32>
    %15 = arith.mulf %9, %10 : vector<8x128xf32>
    %cst_7 = arith.constant dense<0.000000e+00> : vector<8xf32>
    %16 = vector.multi_reduction <add>, %15, %cst_7 [1] : vector<8x128xf32> to vector<8xf32>
    %17 = vector.shape_cast %16 : vector<8xf32> to vector<8x1xf32>
    %cst_8 = arith.constant dense<0xFF800000> : vector<8xf32>
    %18 = vector.multi_reduction <maximumf>, %14, %cst_8 [1] : vector<8x8xf32> to vector<8xf32>
    %19 = vector.shape_cast %18 : vector<8xf32> to vector<8x1xf32>
    %20 = arith.maximumf %17, %19 : vector<8x1xf32>
    %21 = arith.subf %17, %20 : vector<8x1xf32>
    %22 = math.exp %21 : vector<8x1xf32>
    %23 = vector.broadcast %20 : vector<8x1xf32> to vector<8x8xf32>
    %24 = arith.subf %14, %23 : vector<8x8xf32>
    %25 = math.exp %24 : vector<8x8xf32>
    %cst_9 = arith.constant dense<0.000000e+00> : vector<8xf32>
    %26 = vector.multi_reduction <add>, %25, %cst_9 [1] : vector<8x8xf32> to vector<8xf32>
    %27 = vector.shape_cast %26 : vector<8xf32> to vector<8x1xf32>
    %28 = arith.addf %22, %27 : vector<8x1xf32>
    %29 = tpu.reciprocal %28 {approx = true} : vector<8x1xf32> -> vector<8x1xf32>
    %30 = arith.mulf %22, %29 : vector<8x1xf32>
    %31 = vector.broadcast %29 : vector<8x1xf32> to vector<8x8xf32>
    %32 = arith.mulf %25, %31 : vector<8x8xf32>
    %33 = vector.broadcast %30 : vector<8x1xf32> to vector<8x128xf32>
    %34 = arith.mulf %33, %11 : vector<8x128xf32>
    %cst_10 = arith.constant dense<0.000000e+00> : vector<8x128xf32>
    %35 = tpu.matmul %32, %13, %cst_10 {dimension_numbers = #tpu.dot_dimension_numbers<[1], [0], [0], [1], [0, 0, 1, 1], [], []>} : vector<8x8xf32>, vector<8x128xf32>, vector<8x128xf32> -> vector<8x128xf32>
    %36 = arith.addf %34, %35 : vector<8x128xf32>
    %c0_11 = arith.constant 0 : index
    %c0_12 = arith.constant 0 : index
    %37 = vector.load %arg4[%c0_11, %c0_12] : memref<8x128xf32, #tpu.memory_space<vmem>>, vector<1x128xf32>
    %c1 = arith.constant 1 : index
    %c0_13 = arith.constant 0 : index
    %38 = vector.load %arg4[%c1, %c0_13] : memref<8x128xf32, #tpu.memory_space<vmem>>, vector<1x128xf32>
    %c2 = arith.constant 2 : index
    %c0_14 = arith.constant 0 : index
    %39 = vector.load %arg4[%c2, %c0_14] : memref<8x128xf32, #tpu.memory_space<vmem>>, vector<1x128xf32>
    %c3 = arith.constant 3 : index
    %c0_15 = arith.constant 0 : index
    %40 = vector.load %arg4[%c3, %c0_15] : memref<8x128xf32, #tpu.memory_space<vmem>>, vector<1x128xf32>
    %c4 = arith.constant 4 : index
    %c0_16 = arith.constant 0 : index
    %41 = vector.load %arg4[%c4, %c0_16] : memref<8x128xf32, #tpu.memory_space<vmem>>, vector<1x128xf32>
    %c5 = arith.constant 5 : index
    %c0_17 = arith.constant 0 : index
    %42 = vector.load %arg4[%c5, %c0_17] : memref<8x128xf32, #tpu.memory_space<vmem>>, vector<1x128xf32>
    %43 = arith.addf %36, %1 : vector<8x128xf32>
    %cst_18 = arith.constant dense<0.000000e+00> : vector<8xf32>
    %44 = vector.multi_reduction <add>, %43, %cst_18 [1] : vector<8x128xf32> to vector<8xf32>
    %45 = vector.shape_cast %44 : vector<8xf32> to vector<8x1xf32>
    %cst_19 = arith.constant 1.280000e+02 : f32
    %46 = vector.broadcast %cst_19 : f32 to vector<8x1xf32>
    %47 = arith.divf %45, %46 : vector<8x1xf32>
    %48 = vector.broadcast %47 : vector<8x1xf32> to vector<8x128xf32>
    %49 = arith.subf %43, %48 : vector<8x128xf32>
    %50 = arith.mulf %49, %49 : vector<8x128xf32>
    %cst_20 = arith.constant dense<0.000000e+00> : vector<8xf32>
    %51 = vector.multi_reduction <add>, %50, %cst_20 [1] : vector<8x128xf32> to vector<8xf32>
    %52 = vector.shape_cast %51 : vector<8xf32> to vector<8x1xf32>
    %cst_21 = arith.constant 1.280000e+02 : f32
    %53 = vector.broadcast %cst_21 : f32 to vector<8x1xf32>
    %54 = arith.divf %52, %53 : vector<8x1xf32>
    %55 = vector.broadcast %47 : vector<8x1xf32> to vector<8x128xf32>
    %56 = arith.subf %43, %55 : vector<8x128xf32>
    %cst_22 = arith.constant 9.99999997E-7 : f32
    %57 = vector.broadcast %cst_22 : f32 to vector<8x1xf32>
    %58 = arith.addf %54, %57 : vector<8x1xf32>
    %59 = math.rsqrt %58 : vector<8x1xf32>
    %60 = vector.broadcast %59 : vector<8x1xf32> to vector<8x128xf32>
    %61 = arith.mulf %56, %60 : vector<8x128xf32>
    %62 = vector.broadcast %37 : vector<1x128xf32> to vector<8x128xf32>
    %63 = arith.mulf %61, %62 : vector<8x128xf32>
    %64 = vector.broadcast %38 : vector<1x128xf32> to vector<8x128xf32>
    %65 = arith.addf %63, %64 : vector<8x128xf32>
    %66 = arith.truncf %65 : vector<8x128xf32> to vector<8x128xbf16>
    %c0_23 = arith.constant 0 : index
    %c0_24 = arith.constant 0 : index
    %67 = vector.load %arg2[%c0_23, %c0_24] : memref<128x128xbf16, #tpu.memory_space<vmem>>, vector<128x128xbf16>
    %cst_25 = arith.constant dense<0.000000e+00> : vector<8x128xf32>
    %68 = tpu.matmul %66, %67, %cst_25 {dimension_numbers = #tpu.dot_dimension_numbers<[1], [0], [0], [1], [0, 0, 1, 1], [], []>} : vector<8x128xbf16>, vector<128x128xbf16>, vector<8x128xf32> -> vector<8x128xf32>
    %69 = vector.broadcast %39 : vector<1x128xf32> to vector<8x128xf32>
    %70 = arith.addf %68, %69 : vector<8x128xf32>
    %cst_26 = arith.constant 0.000000e+00 : f32
    %71 = vector.broadcast %cst_26 : f32 to vector<8x128xf32>
    %72 = arith.maximumf %70, %71 : vector<8x128xf32>
    %73 = arith.truncf %72 : vector<8x128xf32> to vector<8x128xbf16>
    %c0_27 = arith.constant 0 : index
    %c0_28 = arith.constant 0 : index
    %74 = vector.load %arg3[%c0_27, %c0_28] : memref<128x128xbf16, #tpu.memory_space<vmem>>, vector<128x128xbf16>
    %cst_29 = arith.constant dense<0.000000e+00> : vector<8x128xf32>
    %75 = tpu.matmul %73, %74, %cst_29 {dimension_numbers = #tpu.dot_dimension_numbers<[1], [0], [0], [1], [0, 0, 1, 1], [], []>} : vector<8x128xbf16>, vector<128x128xbf16>, vector<8x128xf32> -> vector<8x128xf32>
    %76 = vector.broadcast %40 : vector<1x128xf32> to vector<8x128xf32>
    %77 = arith.addf %75, %76 : vector<8x128xf32>
    %78 = arith.addf %77, %65 : vector<8x128xf32>
    %cst_30 = arith.constant dense<0.000000e+00> : vector<8xf32>
    %79 = vector.multi_reduction <add>, %78, %cst_30 [1] : vector<8x128xf32> to vector<8xf32>
    %80 = vector.shape_cast %79 : vector<8xf32> to vector<8x1xf32>
    %cst_31 = arith.constant 1.280000e+02 : f32
    %81 = vector.broadcast %cst_31 : f32 to vector<8x1xf32>
    %82 = arith.divf %80, %81 : vector<8x1xf32>
    %83 = vector.broadcast %82 : vector<8x1xf32> to vector<8x128xf32>
    %84 = arith.subf %78, %83 : vector<8x128xf32>
    %85 = arith.mulf %84, %84 : vector<8x128xf32>
    %cst_32 = arith.constant dense<0.000000e+00> : vector<8xf32>
    %86 = vector.multi_reduction <add>, %85, %cst_32 [1] : vector<8x128xf32> to vector<8xf32>
    %87 = vector.shape_cast %86 : vector<8xf32> to vector<8x1xf32>
    %cst_33 = arith.constant 1.280000e+02 : f32
    %88 = vector.broadcast %cst_33 : f32 to vector<8x1xf32>
    %89 = arith.divf %87, %88 : vector<8x1xf32>
    %90 = vector.broadcast %82 : vector<8x1xf32> to vector<8x128xf32>
    %91 = arith.subf %78, %90 : vector<8x128xf32>
    %cst_34 = arith.constant 9.99999997E-7 : f32
    %92 = vector.broadcast %cst_34 : f32 to vector<8x1xf32>
    %93 = arith.addf %89, %92 : vector<8x1xf32>
    %94 = math.rsqrt %93 : vector<8x1xf32>
    %95 = vector.broadcast %94 : vector<8x1xf32> to vector<8x128xf32>
    %96 = arith.mulf %91, %95 : vector<8x128xf32>
    %97 = vector.broadcast %41 : vector<1x128xf32> to vector<8x128xf32>
    %98 = arith.mulf %96, %97 : vector<8x128xf32>
    %99 = vector.broadcast %42 : vector<1x128xf32> to vector<8x128xf32>
    %100 = arith.addf %98, %99 : vector<8x128xf32>
    %c0_35 = arith.constant 0 : index
    %c0_36 = arith.constant 0 : index
    %101 = vector.load %arg6[%c0_35, %c0_36] : memref<8x128xf32, #tpu.memory_space<vmem>>, vector<8x128xf32>
    tpu.vector_store %arg6[%c0_35, %c0_36], %100 {strides = array<i32>} : memref<8x128xf32, #tpu.memory_space<vmem>>, vector<8x128xf32>,
    return
  }
}

</mosaic_0001>

<bundles_post_ra>
// kernel: tpu_custom_call.1
= control target key start
LH: loop header
LB: loop body
LE: loop exit
PB: predicated region body
PF: predicated region fallthrough
CT: control target
= control target key end

     0   :  { %12 = vsyncpa [#allocation4], 0  ;;  %s1247_s0 = inlined_call_operand.hbm [shape: f32[16,128], index: 0, kind: input, shape index: {}]   ;;  %s1248_s1 = inlined_call_operand.hbm [shape: bf16[128,384], index: 1, kind: input, shape index: {}]   ;;  %s1249_s2 = inlined_call_operand.hbm [shape: bf16[128,128], index: 2, kind: input, shape index: {}]   ;;  %s1250_s3 = inlined_call_operand.hbm [shape: bf16[128,128], index: 3, kind: input, shape index: {}]   ;;  %s1251_s4 = inlined_call_operand.vmem [shape: f32[8,128], index: 4, kind: input, shape index: {}]   ;;  %s1252_s5 = inlined_call_operand.<no memory space> [shape: f32[1,1], index: 5, kind: input, shape index: {}]   ;;  %s1253_s6 = inlined_call_operand.hbm [shape: f32[8,128], index: 6, kind: output, shape index: {}]  }
   0x1   :  { %13 = vsyncpa [#allocation7], 0 }
   0x2   :  { %14 = vsyncpa [#allocation10], 0 }
   0x3   :  { %15 = vsyncpa [#allocation5], 0  ;;  %s1119_s21 = smov [#allocation6]  }
   0x4   :  { %s33_s22 = sshll.u32 %s1119_s21, 4  ;;  %s34_s22 = int_to_ptr.vmem [resolvable:$true] %s33_s22 }
   0x5   :  { %s1019_s23 = scalar_lea.vmem %s34_s22, 3072  ;;  %p1024_p1 = scmp.lt.s32.totalorder %s34_s22, %s34_s22 }
   0x6   :  { %p1020_p0 = scmp.ne.s32.totalorder %s34_s22, %s1019_s23  ;;  %p1025_p2 = scmp.lt.s32.totalorder %s1019_s23, %s1019_s23 }
   0x8   :  { %p1026_p3 = por %p1025_p2, %p1024_p1 }
   0xa   :  { %p1027_p4 = pnand %p1026_p3, %p1020_p0 }
   0xc   :  { %1030 = shalt.err (!%p1027_p4)
}
   0xd   :  { %s1120_s24 = smov 192   ;;  %s1121_s25 = smov 12  }
   0xe   :  { %39 = dma.hbm_to_vmem [thread:$0]  %s1248_s1, 3072, %s34_s22, [#allocation7], %s1120_s24, %s1120_s24, %s1121_s25  }
   0xf   :  { %s1122_s28 = smov [#allocation3]  }
  0x10   :  { %s21_s29 = sshll.u32 %s1122_s28, 4  ;;  %s22_s29 = int_to_ptr.vmem [resolvable:$true] %s21_s29 }
  0x11   :  { %s1039_s30 = scalar_lea.vmem %s22_s29, 256  ;;  %p1044_p6 = scmp.lt.s32.totalorder %s22_s29, %s22_s29 }
  0x12   :  { %p1040_p5 = scmp.ne.s32.totalorder %s22_s29, %s1039_s30  ;;  %p1045_p7 = scmp.lt.s32.totalorder %s1039_s30, %s1039_s30 }
  0x14   :  { %p1046_p8 = por %p1045_p7, %p1044_p6 }
  0x16   :  { %p1047_p9 = pnand %p1046_p8, %p1040_p5 }
  0x18   :  { %1050 = shalt.err (!%p1047_p9)
}
  0x19   :  { %s1123_s7 = smov 128   ;;  %s1124_s8 = smov 8  }
  0x1a   :  { %27 = dma.hbm_to_vmem [thread:$0]  %s1247_s0, 256, %s22_s29, [#allocation4], %s1123_s7, %s1123_s7, %s1124_s8  }
  0x1b   :  { %s1125_s11 = smov [#allocation8]  }
  0x1c   :  { %s45_s12 = sshll.u32 %s1125_s11, 4  ;;  %s46_s12 = int_to_ptr.vmem [resolvable:$true] %s45_s12 }
  0x1d   :  { %s1059_s1 = scalar_lea.vmem %s46_s12, 1024  ;;  %p1064_p11 = scmp.lt.s32.totalorder %s46_s12, %s46_s12 }
  0x1e   :  { %p1060_p10 = scmp.ne.s32.totalorder %s46_s12, %s1059_s1  ;;  %p1065_p12 = scmp.lt.s32.totalorder %s1059_s1, %s1059_s1 }
  0x20   :  { %p1066_p13 = por %p1065_p12, %p1064_p11 }
  0x22   :  { %p1067_p0 = pnand %p1066_p13, %p1060_p10 }
  0x24   :  { %1070 = shalt.err (!%p1067_p0)
}
  0x25   :  { %s1126_s13 = smov 64   ;;  %s1127_s14 = smov 4  }
  0x26   :  { %51 = dma.hbm_to_vmem [thread:$0]  %s1249_s2, 1024, %s46_s12, [#allocation7], %s1126_s13, %s1126_s13, %s1127_s14  }
  0x27   :  { %s1128_s17 = smov [#allocation9]  }
  0x28   :  { %s57_s18 = sshll.u32 %s1128_s17, 4  ;;  %s58_s18 = int_to_ptr.vmem [resolvable:$true] %s57_s18 }
  0x29   :  { %s1079_s0 = scalar_lea.vmem %s58_s18, 1024  ;;  %p1084_p2 = scmp.lt.s32.totalorder %s58_s18, %s58_s18 }
  0x2a   :  { %p1080_p1 = scmp.ne.s32.totalorder %s58_s18, %s1079_s0  ;;  %p1085_p3 = scmp.lt.s32.totalorder %s1079_s0, %s1079_s0 }
  0x2c   :  { %p1086_p4 = por %p1085_p3, %p1084_p2 }
  0x2e   :  { %p1087_p5 = pnand %p1086_p4, %p1080_p1 }
  0x30   :  { %1090 = shalt.err (!%p1087_p5)
}
  0x31   :  { %63 = dma.hbm_to_vmem [thread:$0]  %s1250_s3, 1024, %s58_s18, [#allocation10], %s1126_s13, %s1126_s13, %s1127_s14  }
  0x32   :  { %1111 = dma.done.wait [#allocation4], 256  }
  0x33   :  { %1112 = vsyncadd [#allocation4], 4294967040 }
  0x34   :  { %1113 = dma.done.wait [#allocation7], 4096  }
  0x35   :  { %1114 = vsyncadd [#allocation7], 4294963200 }
  0x36   :  { %1115 = dma.done.wait [#allocation10], 1024  }
  0x37   :  { %1116 = vsyncadd [#allocation10], 4294966272  ;;  %v328_v0 = vstv %s1252_s5  ;;  %v1129_v1 = vmov 0   ;;  %v951_v2 = vld [vmem:[#allocation6 + $0xac] ss:$12 sps:$4 sm:$0xff]   ;;  %v1183_v19 = vld [vmem:[#allocation3] sm:$0xff] }
  0x38   :  { %276 = vmatprep.mubr.bf16.mxu0 %v1129_v1  ;;  %999 = vrcp.f32 %v328_v0  ;;  %v953_v3 = vld [vmem:[#allocation6 + $0xa8] ss:$12 sps:$4 sm:$0xff]   ;;  %244 = vmatprep.subr.bf16.mxu0 %v951_v2  ;;  %v956_v5 = vld [vmem:[#allocation6 + $0x90] ss:$12 sps:$4 sm:$0xff]   ;;  %v959_v8 = vld [vmem:[#allocation6 + $0x78] ss:$12 sps:$4 sm:$0xff]  }
  0x39   :  { %v954_v4 = vld [vmem:[#allocation6 + $0x94] ss:$12 sps:$4 sm:$0xff]   ;;  %245 = vmatpush1.bf16.msra.mxu0 %v953_v3  ;;  %v957_v6 = vld [vmem:[#allocation6 + $0x7c] ss:$12 sps:$4 sm:$0xff]   ;;  %v960_v9 = vld [vmem:[#allocation6 + $0x64] ss:$12 sps:$4 sm:$0xff]  }
  0x3a   :  { %246 = vmatprep.subr.bf16.mxu0 %v954_v4  ;;  %v962_v10 = vld [vmem:[#allocation6 + $0x60] ss:$12 sps:$4 sm:$0xff]   ;;  %v965_v12 = vld [vmem:[#allocation6 + $0x48] ss:$12 sps:$4 sm:$0xff]   ;;  %v968_v14 = vld [vmem:[#allocation6 + $0x30] ss:$12 sps:$4 sm:$0xff]  }
  0x3b   :  { %v963_v11 = vld [vmem:[#allocation6 + $0x4c] ss:$12 sps:$4 sm:$0xff]   ;;  %v966_v13 = vld [vmem:[#allocation6 + $0x34] ss:$12 sps:$4 sm:$0xff]   ;;  %v969_v15 = vld [vmem:[#allocation6 + $0x1c] ss:$12 sps:$4 sm:$0xff]  }
  0x3c   :  { %v971_v16 = vld [vmem:[#allocation6 + $0x18] ss:$12 sps:$4 sm:$0xff]   ;;  %v974_v18 = vld [vmem:[#allocation6] ss:$12 sps:$4 sm:$0xff]   ;;  %v1130_v22 = vmov 0.0   ;;  %vm1131_vm0 = vmmov 0  }
  0x3d   :  { %247 = vmatpush1.bf16.msra.mxu0 %v956_v5  ;;  %v972_v17 = vld [vmem:[#allocation6 + $0x4] ss:$12 sps:$4 sm:$0xff]   ;;  %v82_v20 = vld [vmem:[#allocation3 + $0x8] sm:$0xff]  ;;  %865 = vmatprep.subr.bf16.mxu1 %v1130_v22  ;;  %v977_v32 = vld [vmem:[#allocation6 + $0x80] ss:$12 sps:$4 sm:$0xff]   ;;  %vm406_vm1 = vcmask 64512  }
  0x3e   :  { %248 = vmatprep.subr.bf16.mxu0 %v957_v6  ;;  %v83_v21 = vpack.c.bf16 %v82_v20, %v1183_v19  ;;  %881 = vmatprep.mubr.msk.bf16.mxu1 %vm1131_vm0, %v1130_v22  ;;  %v975_v30 = vld [vmem:[#allocation6 + $0xb0] ss:$12 sps:$4 sm:$0xff]   ;;  %v976_v31 = vld [vmem:[#allocation6 + $0x98] ss:$12 sps:$4 sm:$0xff]   ;;  %v978_v33 = vld [vmem:[#allocation6 + $0x68] ss:$12 sps:$4 sm:$0xff]  }
  0x3f   :  { %866 = vmatpush3.bf16.msra.mxu1 %v975_v30  ;;  %v979_v34 = vld [vmem:[#allocation6 + $0x50] ss:$12 sps:$4 sm:$0xff]   ;;  %v980_v35 = vld [vmem:[#allocation6 + $0x38] ss:$12 sps:$4 sm:$0xff]   ;;  %v981_v36 = vld [vmem:[#allocation6 + $0x20] ss:$12 sps:$4 sm:$0xff]  }
  0x40   :  { %867 = vmatprep.subr.bf16.mxu1 %v1130_v22  ;;  %v982_v37 = vld [vmem:[#allocation6 + $0x8] ss:$12 sps:$4 sm:$0xff]   ;;  %v983_v1 = vld [vmem:[#allocation8 + $0x38] sm:$0xff]   ;;  %s1132_s9 = smov [#allocation11]  }
  0x41   :  { %249 = vmatpush1.bf16.msra.mxu0 %v959_v8  ;;  %v984_v2 = vld [vmem:[#allocation8 + $0x30] sm:$0xff]   ;;  %v986_v8 = vld [vmem:[#allocation8 + $0x20] sm:$0xff]   ;;  %v997_v30 = vld [vmem:[#allocation9 + $0x8] sm:$0xff]   ;;  %s776_s10 = sshll.u32 %s1132_s9, 4  ;;  %s777_s10 = int_to_ptr.vmem [resolvable:$true] %s776_s10 }
  0x42   :  { %250 = vmatprep.subr.bf16.mxu0 %v960_v9  ;;  %v987_v9 = vld [vmem:[#allocation8 + $0x18] sm:$0xff]   ;;  %s1091_s11 = scalar_lea.vmem %s777_s10, 128  ;;  %p1096_p7 = scmp.lt.s32.totalorder %s777_s10, %s777_s10 }
  0x43   :  { %868 = vmatpush3.bf16.msra.mxu1 %v976_v31  ;;  %v998_v31 = vld [vmem:[#allocation9] sm:$0xff]   ;;  %p1092_p6 = scmp.ne.s32.totalorder %s777_s10, %s1091_s11  ;;  %p1097_p8 = scmp.lt.s32.totalorder %s1091_s11, %s1091_s11 }
  0x44   :  { %869 = vmatprep.subr.bf16.mxu1 %v1130_v22 }
  0x45   :  { %v1000_v7 = vpop.eup %999  ;;  %251 = vmatpush1.bf16.msra.mxu0 %v962_v10  ;;  %v988_v10 = vld [vmem:[#allocation8 + $0x10] sm:$0xff]   ;;  %p1098_p9 = por %p1097_p8, %p1096_p7 }
  0x46   :  { %935 = vpush %v1000_v7  ;;  %252 = vmatprep.subr.bf16.mxu0 %v963_v11  ;;  %v985_v7 = vld [vmem:[#allocation8 + $0x28] sm:$0xff]  }
  0x47   :  { %870 = vmatpush3.bf16.msra.mxu1 %v977_v32  ;;  %v989_v11 = vld [vmem:[#allocation8 + $0x8] sm:$0xff]   ;;  %v814_v32 = vld [vmem:[%s1251_s4 + $0x2] ss:$0 sm:$0xff]  ;;  %p1099_p10 = pnand %p1098_p9, %p1092_p6 }
  0x48   :  { %871 = vmatprep.subr.bf16.mxu1 %v1130_v22 }
  0x49   :  { %253 = vmatpush1.bf16.msra.mxu0 %v965_v12  ;;  %v990_v12 = vld [vmem:[#allocation8] sm:$0xff]  }
  0x4a   :  { %254 = vmatprep.subr.bf16.mxu0 %v966_v13  ;;  %v991_v13 = vld [vmem:[#allocation9 + $0x38] sm:$0xff]  }
  0x4b   :  { %872 = vmatpush3.bf16.msra.mxu1 %v978_v33 }
  0x4c   :  { %873 = vmatprep.subr.bf16.mxu1 %v1130_v22 }
  0x4d   :  { %255 = vmatpush1.bf16.msra.mxu0 %v968_v14  ;;  %v992_v14 = vld [vmem:[#allocation9 + $0x30] sm:$0xff]  }
  0x4e   :  { %256 = vmatprep.subr.bf16.mxu0 %v969_v15  ;;  %v993_v15 = vld [vmem:[#allocation9 + $0x28] sm:$0xff]  }
  0x4f   :  { %874 = vmatpush3.bf16.msra.mxu1 %v979_v34 }
  0x50   :  { %875 = vmatprep.subr.bf16.mxu1 %v1130_v22 }
  0x51   :  { %257 = vmatpush1.bf16.msra.mxu0 %v971_v16  ;;  %v994_v16 = vld [vmem:[#allocation9 + $0x20] sm:$0xff]  }
  0x52   :  { %258 = vmatprep.subr.bf16.mxu0 %v972_v17  ;;  %v995_v17 = vld [vmem:[#allocation9 + $0x18] sm:$0xff]  }
  0x53   :  { %876 = vmatpush3.bf16.msra.mxu1 %v980_v35 }
  0x54   :  { %877 = vmatprep.subr.bf16.mxu1 %v1130_v22 }
  0x55   :  { %259 = vmatpush1.bf16.msra.mxu0 %v974_v18  ;;  %v996_v18 = vld [vmem:[#allocation9 + $0x10] sm:$0xff]  }
  0x56   :  { %885 = vmatprep.subr.mxu0 %v1130_v22 }
  0x57   :  { %878 = vmatpush3.bf16.msra.mxu1 %v981_v36 }
  0x58   :  { %277 = vmatmul.mubr.bf16.vlgmr.msra.gmra.mxu0 %v83_v21  ;;  %879 = vmatprep.subr.bf16.mxu1 %v1130_v22 }
  0x59   :  { %887 = vmatprep.mubr.msk.f32.mxu0 %vm1131_vm0, %v1130_v22 }
  0x5b   :  { %880 = vmatpush3.bf16.msra.mxu1 %v982_v37 }
  0x5c   :  { %890 = vmatprep.subr.mxu1 %v1130_v22 }
  0x5e   :  { %882 = vmatmul.mubr.bf16.vlgmr.msra.gmra.mxu1 %v83_v21 }
  0x5f   :  { %892 = vmatprep.mubr.msk.f32.mxu1 %vm1131_vm0, %v1130_v22 }
  0x77   :  { %s936_s3 = spop %935 }
  0x78   :  { %v331_v23 = vstv %s936_s3 }
 0x118   :  { %v278_v24 = vpop.f32.mrf.mxu0 }
 0x119   :  { %v332_v25 = vmul.f32 %v331_v23, %v278_v24  ;;  %v812_v24 = vld [vmem:[%s1251_s4] ss:$0 sm:$0xff] }
 0x11a   :  { %v280_v26 = vpop.f32.mrf.mxu0 }
 0x11b   :  { %v403_v27 = vmul.f32 %v332_v25, %v280_v26  ;;  %v813_v26 = vld [vmem:[%s1251_s4 + $0x1] ss:$0 sm:$0xff] }
 0x11c   :  { %v282_v28 = vpop.f32.mrf.mxu0 }
 0x11d   :  { %404 = vadd.xlane.f32.xlu0 %v403_v27 }
 0x11e   :  { %v283_v29 = vpop.f32.mrf.mxu0  ;;  %v320_v49 = vpop.f32.mrf.mxu1 }
 0x11f   :  { %886 = vmatpush3.xpose.msra.mxu0 %v283_v29 }
 0x120   :  { %895 = vmatprep.subr.bf16.mxu0 %v1130_v22  ;;  %v883_v50 = vpop.f32.mrf.mxu1 }
 0x122   :  { %888 = vmatmul.mubr.f32.vlgmr.msra.gmra.mxu0 %v332_v25  ;;  %v323_v51 = vpop.f32.mrf.mxu1 }
 0x123   :  { %911 = vmatprep.mubr.msk.bf16.mxu0 %vm1131_vm0, %v1130_v22  ;;  %891 = vmatpush3.msra.mxu1 %v323_v51 }
 0x124   :  { %v884_v52 = vpop.f32.mrf.mxu1  ;;  %915 = vmatprep.subr.bf16.mxu1 %v1130_v22  ;;  %896 = vmatpush3.bf16.msra.mxu0 %v983_v1 }
 0x125   :  { %897 = vmatprep.subr.bf16.mxu0 %v1130_v22 }
 0x128   :  { %898 = vmatpush3.bf16.msra.mxu0 %v984_v2 }
 0x129   :  { %899 = vmatprep.subr.bf16.mxu0 %v1130_v22 }
 0x12c   :  { %900 = vmatpush3.bf16.msra.mxu0 %v985_v7 }
 0x12d   :  { %901 = vmatprep.subr.bf16.mxu0 %v1130_v22 }
 0x130   :  { %902 = vmatpush3.bf16.msra.mxu0 %v986_v8 }
 0x131   :  { %903 = vmatprep.subr.bf16.mxu0 %v1130_v22 }
 0x134   :  { %904 = vmatpush3.bf16.msra.mxu0 %v987_v9 }
 0x135   :  { %905 = vmatprep.subr.bf16.mxu0 %v1130_v22 }
 0x138   :  { %906 = vmatpush3.bf16.msra.mxu0 %v988_v10 }
 0x139   :  { %907 = vmatprep.subr.bf16.mxu0 %v1130_v22 }
 0x13c   :  { %908 = vmatpush3.bf16.msra.mxu0 %v989_v11 }
 0x13d   :  { %909 = vmatprep.subr.bf16.mxu0 %v1130_v22 }
 0x140   :  { %910 = vmatpush3.bf16.msra.mxu0 %v990_v12 }
 0x1a6   :  { %v405_v41 = vpop.xlane.xlu0 %404 }
 0x1e2   :  { %v399_v38 = vpop.f32.mrf.mxu0 }
 0x1e3   :  { %v407_v39 = vsel %vm406_vm1, %v399_v38, -inf }
 0x1e4   :  { %408 = vmax.xlane.f32.xlu0 %v407_v39  ;;  %v889_v40 = vpop.f32.mrf.mxu0 }
 0x1e5   :  { %v823_v40 = vld [vmem:[%s1251_s4 + $0x3] ss:$0 sm:$0xff] }
 0x26d   :  { %v409_v42 = vpop.xlane.xlu0 %408 }
 0x26e   :  { %v410_v43 = vmax.f32 %v405_v41, %v409_v42 }
 0x270   :  { %v411_v44 = vsub.f32 %v405_v41, %v410_v43  ;;  %v414_v45 = vsub.f32 %v399_v38, %v410_v43 }
 0x272   :  { %v415_v46 = vmul.f32 1.442695, %v414_v45  ;;  %v412_v53 = vmul.f32 1.442695, %v411_v44 }
 0x274   :  { %1001 = vpow2.f32 %v415_v46 }
 0x275   :  { %1003 = vpow2.f32 %v412_v53 }
 0x281   :  { %v1002_v47 = vpop.eup %1001 }
 0x282   :  { %v417_v48 = vsel %vm406_vm1, %v1002_v47, 0.0  ;;  %v1004_v54 = vpop.eup %1003 }
 0x283   :  { %418 = vadd.xlane.f32.xlu1 %v417_v48 }
 0x30c   :  { %v419_v55 = vpop.xlane.xlu1 %418 }
 0x30d   :  { %v420_v56 = vadd.f32 %v1004_v54, %v419_v55 }
 0x30f   :  { %1005 = vrcp.f32 %v420_v56  ;;  %v833_v56 = vld [vmem:[%s1251_s4 + $0x5] ss:$0 sm:$0xff] }
 0x31c   :  { %v1006_v57 = vpop.eup %1005 }
 0x31d   :  { %v422_v58 = vmul.f32 %v1006_v57, %v1004_v54  ;;  %v423_v59 = vmul.f32 %v1006_v57, %v1002_v47  ;;  %v832_v54 = vld [vmem:[%s1251_s4 + $0x4] ss:$0 sm:$0xff] }
 0x31f   :  { %893 = vmatmul.mubr.msk.f32.vlgmr.msra.gmra.mxu1 %vm406_vm1, %v423_v59  ;;  %v424_v60 = vmul.f32 %v422_v58, %v320_v49 }
 0x320   :  { %931 = vmatprep.mubr.msk.bf16.mxu1 %vm1131_vm0, %v1130_v22  ;;  %916 = vmatpush3.bf16.msra.mxu1 %v991_v13 }
 0x321   :  { %917 = vmatprep.subr.bf16.mxu1 %v1130_v22 }
 0x324   :  { %918 = vmatpush3.bf16.msra.mxu1 %v992_v14 }
 0x325   :  { %919 = vmatprep.subr.bf16.mxu1 %v1130_v22 }
 0x328   :  { %920 = vmatpush3.bf16.msra.mxu1 %v993_v15 }
 0x329   :  { %921 = vmatprep.subr.bf16.mxu1 %v1130_v22 }
 0x32c   :  { %922 = vmatpush3.bf16.msra.mxu1 %v994_v16 }
 0x32d   :  { %923 = vmatprep.subr.bf16.mxu1 %v1130_v22 }
 0x330   :  { %924 = vmatpush3.bf16.msra.mxu1 %v995_v17 }
 0x331   :  { %925 = vmatprep.subr.bf16.mxu1 %v1130_v22 }
 0x334   :  { %926 = vmatpush3.bf16.msra.mxu1 %v996_v18 }
 0x335   :  { %927 = vmatprep.subr.bf16.mxu1 %v1130_v22 }
 0x338   :  { %928 = vmatpush3.bf16.msra.mxu1 %v997_v30 }
 0x339   :  { %929 = vmatprep.subr.bf16.mxu1 %v1130_v22 }
 0x33c   :  { %930 = vmatpush3.bf16.msra.mxu1 %v998_v31 }
 0x3df   :  { %v494_v61 = vpop.f32.mrf.mxu1 }
 0x3e0   :  { %v498_v62 = vadd.f32 %v494_v61, %v424_v60 }
 0x3e1   :  { %v894_v63 = vpop.f32.mrf.mxu1 }
 0x3e2   :  { %v505_v0 = vadd.f32 %v498_v62, %v1183_v19 }
 0x3e4   :  { %506 = vadd.xlane.f32.xlu1 %v505_v0 }
 0x46d   :  { %v507_v3 = vpop.xlane.xlu1 %506 }
 0x46e   :  { %v509_v4 = vmul.f32 0.0078125, %v507_v3 }
 0x470   :  { %v510_v5 = vsub.f32 %v505_v0, %v509_v4 }
 0x472   :  { %v511_v6 = vmul.f32 %v510_v5, %v510_v5 }
 0x474   :  { %512 = vadd.xlane.f32.xlu0 %v511_v6 }
 0x4fd   :  { %v513_v19 = vpop.xlane.xlu0 %512 }
 0x4fe   :  { %v514_v20 = vmul.f32 0.0078125, %v513_v19 }
 0x500   :  { %v515_v21 = vadd.f32 1e-06, %v514_v20 }
 0x502   :  { %1007 = vrsqrt.f32 %v515_v21 }
 0x50f   :  { %v1008_v23 = vpop.eup %1007 }
 0x510   :  { %v517_v25 = vmul.f32 %v1008_v23, %v510_v5 }
 0x512   :  { %v522_v27 = vmul.f32 %v812_v24, %v517_v25 }
 0x514   :  { %v527_v28 = vadd.f32 %v813_v26, %v522_v27 }
 0x516   :  { %v528_v29 = vpack.c.bf16 %v527_v28, %v527_v28 }
 0x518   :  { %912 = vmatmul.mubr.bf16.vlgmr.msra.gmra.mxu0 %v528_v29 }
 0x5d8   :  { %v631_v33 = vpop.f32.mrf.mxu0 }
 0x5d9   :  { %v632_v34 = vadd.f32 %v814_v32, %v631_v33 }
 0x5da   :  { %v913_v35 = vpop.f32.mrf.mxu0 }
 0x5db   :  { %v637_v36 = vmax.f32 %v632_v34, 0.0 }
 0x5dc   :  { %v634_v37 = vpop.f32.mrf.mxu0 }
 0x5dd   :  { %v638_v38 = vpack.c.bf16 %v637_v36, %v637_v36 }
 0x5de   :  { %v914_v39 = vpop.f32.mrf.mxu0 }
 0x5df   :  { %932 = vmatmul.mubr.bf16.vlgmr.msra.gmra.mxu1 %v638_v38 }
 0x69f   :  { %v741_v41 = vpop.f32.mrf.mxu1 }
 0x6a0   :  { %v742_v22 = vadd.f32 %v823_v40, %v741_v41 }
 0x6a1   :  { %v933_v42 = vpop.f32.mrf.mxu1 }
 0x6a2   :  { %v747_v43 = vadd.f32 %v742_v22, %v527_v28 }
 0x6a3   :  { %v744_v44 = vpop.f32.mrf.mxu1 }
 0x6a4   :  { %748 = vadd.xlane.f32.xlu1 %v747_v43 }
 0x6a5   :  { %v934_v45 = vpop.f32.mrf.mxu1 }
 0x72d   :  { %v749_v46 = vpop.xlane.xlu1 %748 }
 0x72e   :  { %v750_v47 = vmul.f32 0.0078125, %v749_v46 }
 0x730   :  { %v751_v48 = vsub.f32 %v747_v43, %v750_v47 }
 0x732   :  { %v752_v49 = vmul.f32 %v751_v48, %v751_v48 }
 0x734   :  { %753 = vadd.xlane.f32.xlu0 %v752_v49 }
 0x7bd   :  { %v754_v50 = vpop.xlane.xlu0 %753 }
 0x7be   :  { %v755_v51 = vmul.f32 0.0078125, %v754_v50 }
 0x7c0   :  { %v756_v52 = vadd.f32 1e-06, %v755_v51 }
 0x7c2   :  { %1009 = vrsqrt.f32 %v756_v52 }
 0x7cf   :  { %v1010_v53 = vpop.eup %1009 }
 0x7d0   :  { %v758_v55 = vmul.f32 %v1010_v53, %v751_v48 }
 0x7d2   :  { %v763_v57 = vmul.f32 %v832_v54, %v758_v55 }
 0x7d4   :  { %v768_v58 = vadd.f32 %v833_v56, %v763_v57 }
 0x7d6   :  { %769 = vst [vmem:[#allocation11] sm:$0xff] %v768_v58 }
 0x7d7   :  { %1102 = shalt.err (!%p1099_p10)
}
 0x7d8   :  { %779 = dma.vmem_to_hbm [thread:$0]  %s777_s10, 128, %s1253_s6, [#allocation5]  }
 0x7d9   :  { %1117 = dma.done.wait [#allocation5], 128  }
 0x7da   :  { %1118 = vsyncadd [#allocation5], 4294967168 }
 0x7db   :  { %783 = vsyncpa [#allocation4], 1 }
 0x7dc   :  { %784 = vsyncpa [#allocation7], 1 }
 0x7dd   :  { %785 = vsyncpa [#allocation10], 1 }
 0x7de   :  { %786 = vsyncpa [#allocation5], 1 }

</bundles_post_ra>
